<compile_context>
chip_gen: v5e
topology: v5e:2x2
jax: 0.10.0
libtpu: 0.0.40
codegen_flags: <defaults>
</compile_context>

<pallas_src>
import functools
import math

import jax
import jax.numpy as jnp
from jax.experimental import pallas as pl
from jax.experimental.pallas import tpu as pltpu


_LN_EPS = 1e-5  # torch.nn.LayerNorm default


def _round_up(n: int, m: int) -> int:
    return ((n + m - 1) // m) * m


def _pad_to(x, axis: int, size: int):
    pad = size - x.shape[axis]
    if pad == 0:
        return x
    widths = [(0, 0)] * x.ndim
    widths[axis] = (0, pad)
    return jnp.pad(x, widths)


@functools.lru_cache(maxsize=None)
def _vmem_limit_bytes() -> int:
    """~75% of physical VMEM (96 MiB on v5e/v6e, 48 MiB on v7x), safe fallback."""
    try:
        cap = int(pltpu.get_tpu_info().vmem_capacity_bytes)
        return min((cap * 3) // 4, 100 * 1024 * 1024)
    except Exception:
        return 48 * 1024 * 1024  # fits every generation (v7x physical = 64 MiB)


# -----------------------------------------------------------------------------
# Kernel 1: ensembled trunk  h = tanh(LayerNorm(obs @ Wt[e] + bt[e]))
# grid = (E, B//tb, K//tk), K innermost reduction axis with f32 accumulator.
# -----------------------------------------------------------------------------
def _trunk_kernel(obs_ref, w_ref, b_ref, g_ref, beta_ref, h_ref, acc_ref, *, eps):
    k = pl.program_id(2)

    @pl.when(k == 0)
    def _init():
        # Fold the bias into accumulator init: bias stays resident in VMEM and
        # we skip a full VPU pass over the output tile in the epilogue.
        acc_ref[...] = jnp.broadcast_to(
            b_ref[0].astype(jnp.float32), acc_ref.shape)

    acc_ref[...] += jnp.dot(obs_ref[...], w_ref[0],
                            preferred_element_type=jnp.float32)

    @pl.when(k == pl.num_programs(2) - 1)
    def _epilogue():
        acc = acc_ref[...]                                       # (tb, F) f32
        mean = jnp.mean(acc, axis=-1, keepdims=True)
        xc = acc - mean
        var = jnp.mean(xc * xc, axis=-1, keepdims=True)
        y = xc * jax.lax.rsqrt(var + eps)
        y = y * g_ref[0].astype(jnp.float32) + beta_ref[0].astype(jnp.float32)
        h_ref[0] = jnp.tanh(y).astype(h_ref.dtype)


# -----------------------------------------------------------------------------
# Kernel 2: one Q head (3-layer MLP) per grid step, grid = (2 heads, E, B//tb).
# W1 is split (h-part / action-part) so concat([h, action]) never materializes.
# -----------------------------------------------------------------------------
def _q_mlp_kernel(h_ref, a_ref, w1h_ref, w1a_ref, b1_ref, w2_ref, b2_ref,
                  w3_ref, b3_ref, q_ref):
    f32 = jnp.float32
    h = h_ref[0].astype(f32)                                     # (tb, F)
    a = a_ref[...].astype(f32)                                   # (tb, A)
    z1 = (jnp.dot(h, w1h_ref[0, 0], preferred_element_type=f32)
          + jnp.dot(a, w1a_ref[0, 0], preferred_element_type=f32)
          + b1_ref[0, 0].astype(f32))
    z1 = jnp.maximum(z1, 0.0)
    z2 = (jnp.dot(z1, w2_ref[0, 0], preferred_element_type=f32)
          + b2_ref[0, 0].astype(f32))
    z2 = jnp.maximum(z2, 0.0)
    q = (jnp.dot(z2, w3_ref[0, 0], preferred_element_type=f32)
         + b3_ref[0, 0].astype(f32))                             # (tb, 1)
    q_ref[0, 0] = q.astype(q_ref.dtype)


@functools.partial(jax.jit, static_argnames=("tb_target", "tk_target"))
def critic_ensemble_forward(params, obs, action, *, tb_target=128, tk_target=512):
    """obs: (B, repr_dim), action: (B, A) -> (q1, q2), each (B, num_ensemble)."""
    assert tb_target % 8 == 0 and tk_target % 128 == 0
    B, R = obs.shape
    A = action.shape[-1]
    E, _, F = params["trunk_w"].shape
    H = params["q_w1"].shape[-1]

    # NOTE: for realistic sizes, cast obs / weights to bf16 here (keep the f32
    # accumulators) to halve HBM traffic; kept f32 so the reference check is tight.

    # Tile selection: 8-sublane / 128-lane aligned, clamped to small dims.
    tb = min(tb_target, _round_up(B, 8))
    bp = _round_up(B, tb)
    tk = R if R <= tk_target else tk_target
    kp = _round_up(R, tk)

    obs_p = _pad_to(_pad_to(obs, 0, bp), 1, kp)          # zero pad -> exact math
    act_p = _pad_to(action, 0, bp)
    wt_p = _pad_to(params["trunk_w"], 1, kp)

    vmem = _vmem_limit_bytes()

    # ---- trunk: h[e] = tanh(LN(obs @ Wt[e] + bt[e])) ----
    h = pl.pallas_call(
        functools.partial(_trunk_kernel, eps=_LN_EPS),
        out_shape=jax.ShapeDtypeStruct((E, bp, F), obs.dtype),
        grid_spec=pltpu.PrefetchScalarGridSpec(
            num_scalar_prefetch=0,
            grid=(E, bp // tb, kp // tk),
            in_specs=[
                pl.BlockSpec((tb, tk), lambda e, i, k: (i, k)),
                pl.BlockSpec((1, tk, F), lambda e, i, k: (e, k, 0)),
                pl.BlockSpec((1, 1, F), lambda e, i, k: (e, 0, 0)),
                pl.BlockSpec((1, 1, F), lambda e, i, k: (e, 0, 0)),
                pl.BlockSpec((1, 1, F), lambda e, i, k: (e, 0, 0)),
            ],
            out_specs=pl.BlockSpec((1, tb, F), lambda e, i, k: (e, i, 0)),
            scratch_shapes=[pltpu.VMEM((tb, F), jnp.float32)],
        ),
        compiler_params=pltpu.CompilerParams(
            dimension_semantics=("parallel", "parallel", "arbitrary"),
            vmem_limit_bytes=vmem),
    )(obs_p, wt_p, params["trunk_b"], params["ln_g"], params["ln_b"])

    # Split W1 so concat([h, action], -1) never hits HBM.
    w1 = params["q_w1"]                                  # (2, E, F + A, H)
    w1h, w1a = w1[:, :, :F, :], w1[:, :, F:, :]

    q = pl.pallas_call(
        _q_mlp_kernel,
        out_shape=jax.ShapeDtypeStruct((2, E, bp, 1), obs.dtype),
        grid_spec=pltpu.PrefetchScalarGridSpec(
            num_scalar_prefetch=0,
            grid=(2, E, bp // tb),
            in_specs=[
                pl.BlockSpec((1, tb, F), lambda qi, e, i: (e, i, 0)),
                pl.BlockSpec((tb, A), lambda qi, e, i: (i, 0)),
                pl.BlockSpec((1, 1, F, H), lambda qi, e, i: (qi, e, 0, 0)),
                pl.BlockSpec((1, 1, A, H), lambda qi, e, i: (qi, e, 0, 0)),
                pl.BlockSpec((1, 1, 1, H), lambda qi, e, i: (qi, e, 0, 0)),
                pl.BlockSpec((1, 1, H, H), lambda qi, e, i: (qi, e, 0, 0)),
                pl.BlockSpec((1, 1, 1, H), lambda qi, e, i: (qi, e, 0, 0)),
                pl.BlockSpec((1, 1, H, 1), lambda qi, e, i: (qi, e, 0, 0)),
                pl.BlockSpec((1, 1, 1, 1), lambda qi, e, i: (qi, e, 0, 0)),
            ],
            out_specs=pl.BlockSpec((1, 1, tb, 1), lambda qi, e, i: (qi, e, i, 0)),
        ),
        compiler_params=pltpu.CompilerParams(
            dimension_semantics=("parallel", "parallel", "parallel"),
            vmem_limit_bytes=vmem),
    )(h, act_p, w1h, w1a, params["q_b1"], params["q_w2"], params["q_b2"],
      params["q_w3"], params["q_b3"])

    q1 = q[0, :, :B, 0].T                                # (B, E)
    q2 = q[1, :, :B, 0].T
    return q1, q2


# TODO(synk): parameter init below is synthetic (uniform 1/sqrt(fan_in)); it does
# not replicate utils.weight_init (orthogonal) — only forward semantics matter here.
def init_critic_ensemble(key, repr_dim, action_dim, feature_dim, hidden_dim,
                         num_ensemble, dtype=jnp.float32):
    def uinit(k, shape, fan_in):
        bound = 1.0 / math.sqrt(fan_in)
        return jax.random.uniform(k, shape, dtype, minval=-bound, maxval=bound)

    ks = jax.random.split(key, 8)
    d_in = feature_dim + action_dim
    E = num_ensemble
    return {
        "trunk_w": uinit(ks[0], (E, repr_dim, feature_dim), repr_dim),
        "trunk_b": uinit(ks[1], (E, 1, feature_dim), repr_dim),
        "ln_g": jnp.ones((E, 1, feature_dim), dtype),
        "ln_b": jnp.zeros((E, 1, feature_dim), dtype),
        "q_w1": uinit(ks[2], (2, E, d_in, hidden_dim), d_in),
        "q_b1": uinit(ks[3], (2, E, 1, hidden_dim), d_in),
        "q_w2": uinit(ks[4], (2, E, hidden_dim, hidden_dim), hidden_dim),
        "q_b2": uinit(ks[5], (2, E, 1, hidden_dim), hidden_dim),
        "q_w3": uinit(ks[6], (2, E, hidden_dim, 1), hidden_dim),
        "q_b3": uinit(ks[7], (2, E, 1, 1), hidden_dim),
    }


def critic_ensemble_reference(params, obs, action, eps=_LN_EPS):
    """Pure-JAX reference implementing the PyTorch forward."""
    E = params["trunk_w"].shape[0]
    B, A = action.shape[0], action.shape[-1]
    h = jnp.einsum("bk,ekf->ebf", obs, params["trunk_w"]) + params["trunk_b"]
    mean = h.mean(-1, keepdims=True)
    var = jnp.mean((h - mean) ** 2, axis=-1, keepdims=True)
    h = (h - mean) * jax.lax.rsqrt(var + eps) * params["ln_g"] + params["ln_b"]
    h = jnp.tanh(h)
    ha = jnp.concatenate([h, jnp.broadcast_to(action[None], (E, B, A))], axis=-1)
    z1 = jax.nn.relu(jnp.einsum("ebd,qedh->qebh", ha, params["q_w1"]) + params["q_b1"])
    z2 = jax.nn.relu(jnp.einsum("qebh,qehj->qebj", z1, params["q_w2"]) + params["q_b2"])
    qv = jnp.einsum("qebh,qeho->qebo", z2, params["q_w3"]) + params["q_b3"]
    return qv[0, :, :, 0].T, qv[1, :, :, 0].T


if __name__ == "__main__":
    key = jax.random.PRNGKey(0)
    # Small shapes consistent with the module.
    B, repr_dim, action_dim = 48, 256, 8
    feature_dim, hidden_dim, num_ensemble = 56, 64, 4

    k_obs, k_act, k_par = jax.random.split(key, 3)
    obs = jax.random.normal(k_obs, (B, repr_dim), jnp.float32)
    action = jax.random.uniform(k_act, (B, action_dim), jnp.float32,
                                minval=-1.0, maxval=1.0)
    params = init_critic_ensemble(k_par, repr_dim, action_dim, feature_dim,
                                  hidden_dim, num_ensemble)

    # Small tile targets so the K-accumulator / batch-tiling paths are exercised
    # even at toy sizes (production defaults are tb_target=128, tk_target=512).
    q1, q2 = critic_ensemble_forward(params, obs, action,
                                     tb_target=16, tk_target=128)
    q1, q2 = jax.block_until_ready((q1, q2))

    r1, r2 = critic_ensemble_reference(params, obs, action)
    assert q1.shape == (B, num_ensemble) and q2.shape == (B, num_ensemble)
    assert bool(jnp.allclose(q1, r1, atol=1e-3, rtol=1e-3)), \
        f"max|dq1|={float(jnp.max(jnp.abs(q1 - r1)))}"
    assert bool(jnp.allclose(q2, r2, atol=1e-3, rtol=1e-3)), \
        f"max|dq2|={float(jnp.max(jnp.abs(q2 - r2)))}"

    print("KERNEL_OK")
</pallas_src>

<mosaic_0001>
module attributes {stable_mosaic.version = 11 : i64} {
  func.func @_trunk_kernel(%arg0: i32, %arg1: i32, %arg2: i32, %arg3: memref<16x128xf32, #tpu.memory_space<vmem>>, %arg4: memref<1x128x56xf32, #tpu.memory_space<vmem>>, %arg5: memref<1x1x56xf32, #tpu.memory_space<vmem>>, %arg6: memref<1x1x56xf32, #tpu.memory_space<vmem>>, %arg7: memref<1x1x56xf32, #tpu.memory_space<vmem>>, %arg8: memref<1x16x56xf32, #tpu.memory_space<vmem>>, %arg9: memref<16x56xf32, #tpu.memory_space<vmem>>) attributes {dimension_semantics = [#tpu.dimension_semantics<parallel>, #tpu.dimension_semantics<parallel>, #tpu.dimension_semantics<arbitrary>], iteration_bounds = array<i64: 4, 3, 2>, scalar_prefetch = 0 : i64, scratch_operands = 1 : i64, tpu.core_type = #tpu.core_type<tc>, window_params = [{transform_indices = @transform_0, window_bounds = array<i64: 16, 128>}, {transform_indices = @transform_1, window_bounds = array<i64: 1, 128, 56>}, {transform_indices = @transform_2, window_bounds = array<i64: 1, 1, 56>}, {transform_indices = @transform_3, window_bounds = array<i64: 1, 1, 56>}, {transform_indices = @transform_4, window_bounds = array<i64: 1, 1, 56>}, {transform_indices = @transform_5, window_bounds = array<i64: 1, 16, 56>}]} {
    %c0_i32 = arith.constant 0 : i32
    %0 = arith.cmpi eq, %arg2, %c0_i32 : i32
    %1 = arith.extui %0 : i1 to i32
    %c0_i32_0 = arith.constant 0 : i32
    %2 = arith.cmpi ne, %1, %c0_i32_0 : i32
    scf.if %2 {
      %c0_10 = arith.constant 0 : index
      %c0_11 = arith.constant 0 : index
      %c0_12 = arith.constant 0 : index
      %13 = vector.load %arg5[%c0_10, %c0_11, %c0_12] : memref<1x1x56xf32, #tpu.memory_space<vmem>>, vector<1x1x56xf32>
      %14 = vector.shape_cast %13 : vector<1x1x56xf32> to vector<1x56xf32>
      %15 = vector.shape_cast %14 : vector<1x56xf32> to vector<1x56xf32>
      %16 = vector.broadcast %15 : vector<1x56xf32> to vector<16x56xf32>
      %c0_13 = arith.constant 0 : index
      %c0_14 = arith.constant 0 : index
      %17 = vector.load %arg9[%c0_13, %c0_14] : memref<16x56xf32, #tpu.memory_space<vmem>>, vector<16x56xf32>
      tpu.vector_store %arg9[%c0_13, %c0_14], %16 {strides = array<i32>} : memref<16x56xf32, #tpu.memory_space<vmem>>, vector<16x56xf32>,
    } else {
    }
    %c0 = arith.constant 0 : index
    %c0_1 = arith.constant 0 : index
    %3 = vector.load %arg9[%c0, %c0_1] : memref<16x56xf32, #tpu.memory_space<vmem>>, vector<16x56xf32>
    %c0_2 = arith.constant 0 : index
    %c0_3 = arith.constant 0 : index
    %4 = vector.load %arg3[%c0_2, %c0_3] : memref<16x128xf32, #tpu.memory_space<vmem>>, vector<16x128xf32>
    %c0_4 = arith.constant 0 : index
    %c0_5 = arith.constant 0 : index
    %c0_6 = arith.constant 0 : index
    %5 = vector.load %arg4[%c0_4, %c0_5, %c0_6] : memref<1x128x56xf32, #tpu.memory_space<vmem>>, vector<1x128x56xf32>
    %6 = vector.shape_cast %5 : vector<1x128x56xf32> to vector<128x56xf32>
    %cst = arith.constant dense<0.000000e+00> : vector<16x56xf32>
    %7 = tpu.matmul %4, %6, %cst {dimension_numbers = #tpu.dot_dimension_numbers<[1], [0], [0], [1], [0, 0, 1, 1], [], []>} : vector<16x128xf32>, vector<128x56xf32>, vector<16x56xf32> -> vector<16x56xf32>
    %8 = arith.addf %3, %7 : vector<16x56xf32>
    %c0_7 = arith.constant 0 : index
    %c0_8 = arith.constant 0 : index
    %9 = vector.load %arg9[%c0_7, %c0_8] : memref<16x56xf32, #tpu.memory_space<vmem>>, vector<16x56xf32>
    tpu.vector_store %arg9[%c0_7, %c0_8], %8 {strides = array<i32>} : memref<16x56xf32, #tpu.memory_space<vmem>>, vector<16x56xf32>,
    %c1_i32 = arith.constant 1 : i32
    %10 = arith.cmpi eq, %arg2, %c1_i32 : i32
    %11 = arith.extui %10 : i1 to i32
    %c0_i32_9 = arith.constant 0 : i32
    %12 = arith.cmpi ne, %11, %c0_i32_9 : i32
    scf.if %12 {
      %c0_10 = arith.constant 0 : index
      %c0_11 = arith.constant 0 : index
      %13 = vector.load %arg9[%c0_10, %c0_11] : memref<16x56xf32, #tpu.memory_space<vmem>>, vector<16x56xf32>
      %cst_12 = arith.constant dense<0.000000e+00> : vector<16xf32>
      %14 = vector.multi_reduction <add>, %13, %cst_12 [1] : vector<16x56xf32> to vector<16xf32>
      %15 = vector.shape_cast %14 : vector<16xf32> to vector<16x1xf32>
      %cst_13 = arith.constant 5.600000e+01 : f32
      %16 = vector.broadcast %cst_13 : f32 to vector<16x1xf32>
      %17 = arith.divf %15, %16 : vector<16x1xf32>
      %18 = vector.broadcast %17 : vector<16x1xf32> to vector<16x56xf32>
      %19 = arith.subf %13, %18 : vector<16x56xf32>
      %20 = arith.mulf %19, %19 : vector<16x56xf32>
      %cst_14 = arith.constant dense<0.000000e+00> : vector<16xf32>
      %21 = vector.multi_reduction <add>, %20, %cst_14 [1] : vector<16x56xf32> to vector<16xf32>
      %22 = vector.shape_cast %21 : vector<16xf32> to vector<16x1xf32>
      %cst_15 = arith.constant 5.600000e+01 : f32
      %23 = vector.broadcast %cst_15 : f32 to vector<16x1xf32>
      %24 = arith.divf %22, %23 : vector<16x1xf32>
      %cst_16 = arith.constant 9.99999974E-6 : f32
      %25 = vector.broadcast %cst_16 : f32 to vector<16x1xf32>
      %26 = arith.addf %24, %25 : vector<16x1xf32>
      %27 = math.rsqrt %26 : vector<16x1xf32>
      %28 = vector.broadcast %27 : vector<16x1xf32> to vector<16x56xf32>
      %29 = arith.mulf %19, %28 : vector<16x56xf32>
      %c0_17 = arith.constant 0 : index
      %c0_18 = arith.constant 0 : index
      %c0_19 = arith.constant 0 : index
      %30 = vector.load %arg6[%c0_17, %c0_18, %c0_19] : memref<1x1x56xf32, #tpu.memory_space<vmem>>, vector<1x1x56xf32>
      %31 = vector.shape_cast %30 : vector<1x1x56xf32> to vector<1x56xf32>
      %32 = vector.broadcast %31 : vector<1x56xf32> to vector<16x56xf32>
      %33 = arith.mulf %29, %32 : vector<16x56xf32>
      %c0_20 = arith.constant 0 : index
      %c0_21 = arith.constant 0 : index
      %c0_22 = arith.constant 0 : index
      %34 = vector.load %arg7[%c0_20, %c0_21, %c0_22] : memref<1x1x56xf32, #tpu.memory_space<vmem>>, vector<1x1x56xf32>
      %35 = vector.shape_cast %34 : vector<1x1x56xf32> to vector<1x56xf32>
      %36 = vector.broadcast %35 : vector<1x56xf32> to vector<16x56xf32>
      %37 = arith.addf %33, %36 : vector<16x56xf32>
      %38 = math.tanh %37 : vector<16x56xf32>
      %c0_23 = arith.constant 0 : index
      %c0_24 = arith.constant 0 : index
      %c0_25 = arith.constant 0 : index
      %39 = vector.load %arg8[%c0_23, %c0_24, %c0_25] : memref<1x16x56xf32, #tpu.memory_space<vmem>>, vector<1x16x56xf32>
      %40 = vector.shape_cast %39 : vector<1x16x56xf32> to vector<16x56xf32>
      %41 = vector.shape_cast %38 : vector<16x56xf32> to vector<1x16x56xf32>
      tpu.vector_store %arg8[%c0_23, %c0_24, %c0_25], %41 {strides = array<i32>} : memref<1x16x56xf32, #tpu.memory_space<vmem>>, vector<1x16x56xf32>,
    } else {
    }
    return
  }
  func.func @transform_0(%arg0: i32, %arg1: i32, %arg2: i32) -> (i32, i32) {
    %c0_i32 = arith.constant 0 : i32
    return %arg1, %arg2 : i32, i32
  }
  func.func @transform_1(%arg0: i32, %arg1: i32, %arg2: i32) -> (i32, i32, i32) {
    %c0_i32 = arith.constant 0 : i32
    %c0_i32_0 = arith.constant 0 : i32
    return %arg0, %arg2, %c0_i32 : i32, i32, i32
  }
  func.func @transform_2(%arg0: i32, %arg1: i32, %arg2: i32) -> (i32, i32, i32) {
    %c0_i32 = arith.constant 0 : i32
    %c0_i32_0 = arith.constant 0 : i32
    %c0_i32_1 = arith.constant 0 : i32
    return %arg0, %c0_i32, %c0_i32_0 : i32, i32, i32
  }
  func.func @transform_3(%arg0: i32, %arg1: i32, %arg2: i32) -> (i32, i32, i32) {
    %c0_i32 = arith.constant 0 : i32
    %c0_i32_0 = arith.constant 0 : i32
    %c0_i32_1 = arith.constant 0 : i32
    return %arg0, %c0_i32, %c0_i32_0 : i32, i32, i32
  }
  func.func @transform_4(%arg0: i32, %arg1: i32, %arg2: i32) -> (i32, i32, i32) {
    %c0_i32 = arith.constant 0 : i32
    %c0_i32_0 = arith.constant 0 : i32
    %c0_i32_1 = arith.constant 0 : i32
    return %arg0, %c0_i32, %c0_i32_0 : i32, i32, i32
  }
  func.func @transform_5(%arg0: i32, %arg1: i32, %arg2: i32) -> (i32, i32, i32) {
    %c0_i32 = arith.constant 0 : i32
    %c0_i32_0 = arith.constant 0 : i32
    return %arg0, %arg1, %c0_i32 : i32, i32, i32
  }
}

module attributes {stable_mosaic.version = 11 : i64} {
  func.func @_q_mlp_kernel(%arg0: i32, %arg1: i32, %arg2: i32, %arg3: memref<1x16x56xf32, #tpu.memory_space<vmem>>, %arg4: memref<16x8xf32, #tpu.memory_space<vmem>>, %arg5: memref<1x1x56x64xf32, #tpu.memory_space<vmem>>, %arg6: memref<1x1x8x64xf32, #tpu.memory_space<vmem>>, %arg7: memref<1x1x1x64xf32, #tpu.memory_space<vmem>>, %arg8: memref<1x1x64x64xf32, #tpu.memory_space<vmem>>, %arg9: memref<1x1x1x64xf32, #tpu.memory_space<vmem>>, %arg10: memref<1x1x64x1xf32, #tpu.memory_space<vmem>>, %arg11: memref<1x1x1x1xf32, #tpu.memory_space<vmem>>, %arg12: memref<1x1x16x1xf32, #tpu.memory_space<vmem>>) attributes {dimension_semantics = [#tpu.dimension_semantics<parallel>, #tpu.dimension_semantics<parallel>, #tpu.dimension_semantics<parallel>], iteration_bounds = array<i64: 2, 4, 3>, scalar_prefetch = 0 : i64, scratch_operands = 0 : i64, tpu.core_type = #tpu.core_type<tc>, window_params = [{transform_indices = @transform_0, window_bounds = array<i64: 1, 16, 56>}, {transform_indices = @transform_1, window_bounds = array<i64: 16, 8>}, {transform_indices = @transform_2, window_bounds = array<i64: 1, 1, 56, 64>}, {transform_indices = @transform_3, window_bounds = array<i64: 1, 1, 8, 64>}, {transform_indices = @transform_4, window_bounds = array<i64: 1, 1, 1, 64>}, {transform_indices = @transform_5, window_bounds = array<i64: 1, 1, 64, 64>}, {transform_indices = @transform_6, window_bounds = array<i64: 1, 1, 1, 64>}, {transform_indices = @transform_7, window_bounds = array<i64: 1, 1, 64, 1>}, {transform_indices = @transform_8, window_bounds = array<i64: 1, 1, 1, 1>}, {transform_indices = @transform_9, window_bounds = array<i64: 1, 1, 16, 1>}]} {
    %c0 = arith.constant 0 : index
    %c0_0 = arith.constant 0 : index
    %c0_1 = arith.constant 0 : index
    %0 = vector.load %arg3[%c0, %c0_0, %c0_1] : memref<1x16x56xf32, #tpu.memory_space<vmem>>, vector<1x16x56xf32>
    %1 = vector.shape_cast %0 : vector<1x16x56xf32> to vector<16x56xf32>
    %c0_2 = arith.constant 0 : index
    %c0_3 = arith.constant 0 : index
    %2 = vector.load %arg4[%c0_2, %c0_3] : memref<16x8xf32, #tpu.memory_space<vmem>>, vector<16x8xf32>
    %c0_4 = arith.constant 0 : index
    %c0_5 = arith.constant 0 : index
    %c0_6 = arith.constant 0 : index
    %c0_7 = arith.constant 0 : index
    %3 = vector.load %arg5[%c0_4, %c0_5, %c0_6, %c0_7] : memref<1x1x56x64xf32, #tpu.memory_space<vmem>>, vector<1x1x56x64xf32>
    %4 = vector.shape_cast %3 : vector<1x1x56x64xf32> to vector<56x64xf32>
    %cst = arith.constant dense<0.000000e+00> : vector<16x64xf32>
    %5 = tpu.matmul %1, %4, %cst {dimension_numbers = #tpu.dot_dimension_numbers<[1], [0], [0], [1], [0, 0, 1, 1], [], []>} : vector<16x56xf32>, vector<56x64xf32>, vector<16x64xf32> -> vector<16x64xf32>
    %c0_8 = arith.constant 0 : index
    %c0_9 = arith.constant 0 : index
    %c0_10 = arith.constant 0 : index
    %c0_11 = arith.constant 0 : index
    %6 = vector.load %arg6[%c0_8, %c0_9, %c0_10, %c0_11] : memref<1x1x8x64xf32, #tpu.memory_space<vmem>>, vector<1x1x8x64xf32>
    %7 = vector.shape_cast %6 : vector<1x1x8x64xf32> to vector<8x64xf32>
    %cst_12 = arith.constant dense<0.000000e+00> : vector<16x64xf32>
    %8 = tpu.matmul %2, %7, %cst_12 {dimension_numbers = #tpu.dot_dimension_numbers<[1], [0], [0], [1], [0, 0, 1, 1], [], []>} : vector<16x8xf32>, vector<8x64xf32>, vector<16x64xf32> -> vector<16x64xf32>
    %9 = arith.addf %5, %8 : vector<16x64xf32>
    %c0_13 = arith.constant 0 : index
    %c0_14 = arith.constant 0 : index
    %c0_15 = arith.constant 0 : index
    %c0_16 = arith.constant 0 : index
    %10 = vector.load %arg7[%c0_13, %c0_14, %c0_15, %c0_16] : memref<1x1x1x64xf32, #tpu.memory_space<vmem>>, vector<1x1x1x64xf32>
    %11 = vector.shape_cast %10 : vector<1x1x1x64xf32> to vector<1x64xf32>
    %12 = vector.broadcast %11 : vector<1x64xf32> to vector<16x64xf32>
    %13 = arith.addf %9, %12 : vector<16x64xf32>
    %cst_17 = arith.constant 0.000000e+00 : f32
    %14 = vector.broadcast %cst_17 : f32 to vector<16x64xf32>
    %15 = arith.maximumf %13, %14 : vector<16x64xf32>
    %c0_18 = arith.constant 0 : index
    %c0_19 = arith.constant 0 : index
    %c0_20 = arith.constant 0 : index
    %c0_21 = arith.constant 0 : index
    %16 = vector.load %arg8[%c0_18, %c0_19, %c0_20, %c0_21] : memref<1x1x64x64xf32, #tpu.memory_space<vmem>>, vector<1x1x64x64xf32>
    %17 = vector.shape_cast %16 : vector<1x1x64x64xf32> to vector<64x64xf32>
    %cst_22 = arith.constant dense<0.000000e+00> : vector<16x64xf32>
    %18 = tpu.matmul %15, %17, %cst_22 {dimension_numbers = #tpu.dot_dimension_numbers<[1], [0], [0], [1], [0, 0, 1, 1], [], []>} : vector<16x64xf32>, vector<64x64xf32>, vector<16x64xf32> -> vector<16x64xf32>
    %c0_23 = arith.constant 0 : index
    %c0_24 = arith.constant 0 : index
    %c0_25 = arith.constant 0 : index
    %c0_26 = arith.constant 0 : index
    %19 = vector.load %arg9[%c0_23, %c0_24, %c0_25, %c0_26] : memref<1x1x1x64xf32, #tpu.memory_space<vmem>>, vector<1x1x1x64xf32>
    %20 = vector.shape_cast %19 : vector<1x1x1x64xf32> to vector<1x64xf32>
    %21 = vector.broadcast %20 : vector<1x64xf32> to vector<16x64xf32>
    %22 = arith.addf %18, %21 : vector<16x64xf32>
    %cst_27 = arith.constant 0.000000e+00 : f32
    %23 = vector.broadcast %cst_27 : f32 to vector<16x64xf32>
    %24 = arith.maximumf %22, %23 : vector<16x64xf32>
    %c0_28 = arith.constant 0 : index
    %c0_29 = arith.constant 0 : index
    %c0_30 = arith.constant 0 : index
    %c0_31 = arith.constant 0 : index
    %25 = vector.load %arg10[%c0_28, %c0_29, %c0_30, %c0_31] : memref<1x1x64x1xf32, #tpu.memory_space<vmem>>, vector<1x1x64x1xf32>
    %26 = vector.shape_cast %25 : vector<1x1x64x1xf32> to vector<64x1xf32>
    %cst_32 = arith.constant dense<0.000000e+00> : vector<16x1xf32>
    %27 = tpu.matmul %24, %26, %cst_32 {dimension_numbers = #tpu.dot_dimension_numbers<[1], [0], [0], [1], [0, 0, 1, 1], [], []>} : vector<16x64xf32>, vector<64x1xf32>, vector<16x1xf32> -> vector<16x1xf32>
    %c0_33 = arith.constant 0 : index
    %c0_34 = arith.constant 0 : index
    %c0_35 = arith.constant 0 : index
    %c0_36 = arith.constant 0 : index
    %28 = vector.load %arg11[%c0_33, %c0_34, %c0_35, %c0_36] : memref<1x1x1x1xf32, #tpu.memory_space<vmem>>, vector<1x1x1x1xf32>
    %29 = vector.shape_cast %28 : vector<1x1x1x1xf32> to vector<1x1xf32>
    %30 = vector.broadcast %29 : vector<1x1xf32> to vector<16x1xf32>
    %31 = arith.addf %27, %30 : vector<16x1xf32>
    %c0_37 = arith.constant 0 : index
    %c0_38 = arith.constant 0 : index
    %c0_39 = arith.constant 0 : index
    %c0_40 = arith.constant 0 : index
    %32 = vector.load %arg12[%c0_37, %c0_38, %c0_39, %c0_40] : memref<1x1x16x1xf32, #tpu.memory_space<vmem>>, vector<1x1x16x1xf32>
    %33 = vector.shape_cast %32 : vector<1x1x16x1xf32> to vector<16x1xf32>
    %34 = vector.shape_cast %31 : vector<16x1xf32> to vector<1x1x16x1xf32>
    tpu.vector_store %arg12[%c0_37, %c0_38, %c0_39, %c0_40], %34 {strides = array<i32>} : memref<1x1x16x1xf32, #tpu.memory_space<vmem>>, vector<1x1x16x1xf32>,
    return
  }
  func.func @transform_0(%arg0: i32, %arg1: i32, %arg2: i32) -> (i32, i32, i32) {
    %c0_i32 = arith.constant 0 : i32
    %c0_i32_0 = arith.constant 0 : i32
    return %arg1, %arg2, %c0_i32 : i32, i32, i32
  }
  func.func @transform_1(%arg0: i32, %arg1: i32, %arg2: i32) -> (i32, i32) {
    %c0_i32 = arith.constant 0 : i32
    %c0_i32_0 = arith.constant 0 : i32
    return %arg2, %c0_i32 : i32, i32
  }
  func.func @transform_2(%arg0: i32, %arg1: i32, %arg2: i32) -> (i32, i32, i32, i32) {
    %c0_i32 = arith.constant 0 : i32
    %c0_i32_0 = arith.constant 0 : i32
    %c0_i32_1 = arith.constant 0 : i32
    return %arg0, %arg1, %c0_i32, %c0_i32_0 : i32, i32, i32, i32
  }
  func.func @transform_3(%arg0: i32, %arg1: i32, %arg2: i32) -> (i32, i32, i32, i32) {
    %c0_i32 = arith.constant 0 : i32
    %c0_i32_0 = arith.constant 0 : i32
    %c0_i32_1 = arith.constant 0 : i32
    return %arg0, %arg1, %c0_i32, %c0_i32_0 : i32, i32, i32, i32
  }
  func.func @transform_4(%arg0: i32, %arg1: i32, %arg2: i32) -> (i32, i32, i32, i32) {
    %c0_i32 = arith.constant 0 : i32
    %c0_i32_0 = arith.constant 0 : i32
    %c0_i32_1 = arith.constant 0 : i32
    return %arg0, %arg1, %c0_i32, %c0_i32_0 : i32, i32, i32, i32
  }
  func.func @transform_5(%arg0: i32, %arg1: i32, %arg2: i32) -> (i32, i32, i32, i32) {
    %c0_i32 = arith.constant 0 : i32
    %c0_i32_0 = arith.constant 0 : i32
    %c0_i32_1 = arith.constant 0 : i32
    return %arg0, %arg1, %c0_i32, %c0_i32_0 : i32, i32, i32, i32
  }
  func.func @transform_6(%arg0: i32, %arg1: i32, %arg2: i32) -> (i32, i32, i32, i32) {
    %c0_i32 = arith.constant 0 : i32
    %c0_i32_0 = arith.constant 0 : i32
    %c0_i32_1 = arith.constant 0 : i32
    return %arg0, %arg1, %c0_i32, %c0_i32_0 : i32, i32, i32, i32
  }
  func.func @transform_7(%arg0: i32, %arg1: i32, %arg2: i32) -> (i32, i32, i32, i32) {
    %c0_i32 = arith.constant 0 : i32
    %c0_i32_0 = arith.constant 0 : i32
    %c0_i32_1 = arith.constant 0 : i32
    return %arg0, %arg1, %c0_i32, %c0_i32_0 : i32, i32, i32, i32
  }
  func.func @transform_8(%arg0: i32, %arg1: i32, %arg2: i32) -> (i32, i32, i32, i32) {
    %c0_i32 = arith.constant 0 : i32
    %c0_i32_0 = arith.constant 0 : i32
    %c0_i32_1 = arith.constant 0 : i32
    return %arg0, %arg1, %c0_i32, %c0_i32_0 : i32, i32, i32, i32
  }
  func.func @transform_9(%arg0: i32, %arg1: i32, %arg2: i32) -> (i32, i32, i32, i32) {
    %c0_i32 = arith.constant 0 : i32
    %c0_i32_0 = arith.constant 0 : i32
    return %arg0, %arg1, %arg2, %c0_i32 : i32, i32, i32, i32
  }
}

</mosaic_0001>

<bundles_post_ra>
// kernel: critic_ensemble_forward.2
= control target key start
LH: loop header
LB: loop body
LE: loop exit
PB: predicated region body
PF: predicated region fallthrough
CT: control target
= control target key end

     0   :  { %s1058_s0 = inlined_call_operand.vmem [shape: f32[48,256], index: 0, kind: input, shape index: {}]   ;;  %s1059_s1 = inlined_call_operand.vmem [shape: f32[4,256,56], index: 1, kind: input, shape index: {}]   ;;  %s1060_s2 = inlined_call_operand.vmem [shape: f32[4,1,56], index: 2, kind: input, shape index: {}]   ;;  %s1061_s3 = inlined_call_operand.vmem [shape: f32[4,1,56], index: 3, kind: input, shape index: {}]   ;;  %s1062_s4 = inlined_call_operand.vmem [shape: f32[4,1,56], index: 4, kind: input, shape index: {}]   ;;  %s1063_s5 = inlined_call_operand.vmem [shape: f32[4,48,56], index: 5, kind: output, shape index: {}]  }
   0x1   :  { %1068 = sst [smem:[#allocation9_spill]] %s1058_s0 }
   0x2   :  { %s879_s18 = smov 0   ;;  %s881_s19 = smov 0  }
   0x3   :  { %s883_s20 = smov 0   ;;  %s885_s21 = smov 0  }
   0x4   :  { %s887_s22 = smov 0   ;;  %s889_s23 = smov 0  }
   0x5   :  { %s891_s24 = smov 0   ;;  %s893_s25 = smov 0  }
   0x6   :  { %s895_s26 = smov 0  }
   0x7 LB: > { %1069 = sst [smem:[#allocation4_spill]] %s838_s24  ;;  %s27_s27 = sadd.s32 1, %s834_s23  ;;  %s846_s26 = sphi %s895_s26, %s15_s26   ;;  %s842_s25 = sphi %s893_s25, %s1079_s25   ;;  %s838_s24 = sphi %s891_s24, %s1078_s24   ;;  %s834_s23 = sphi %s889_s23, %s1083_s23   ;;  %s830_s22 = sphi %s887_s22, %s1076_s22   ;;  %s826_s21 = sphi %s885_s21, %s1075_s21   ;;  %s822_s20 = sphi %s883_s20, %s1082_s20   ;;  %s818_s19 = sphi %s881_s19, %s1081_s19   ;;  %s814_s18 = sphi %s879_s18, %s1080_s18  }
   0x8   : > { %1070 = sst [smem:[#allocation5_spill]] %s842_s25  ;;  %p28_p0 = scmp.ge.s32.totalorder %s27_s27, 2 }
   0x9   : > { %s30_s28 = sadd.s32 1, %s838_s24  ;;  %p50_p1 = scmp.ne.s32.totalorder %s818_s19, %s814_s18 }
   0xa   : > { %s1085_s27 = smov (%p28_p0, %s27_s27), 0  ;;  %s1087_s28 = smov (!%p28_p0, %s30_s28), %s838_s24 }
   0xb   : > { %1071 = sst [smem:[#allocation6_spill]] %s1085_s27  ;;  %p51_p2 = scmp.eq.s32.totalorder %s846_s26, 0 }
   0xc   : > { %p32_p3 = scmp.ge.s32.totalorder %s1087_s28, 3  ;;  %s34_s29 = sadd.s32 1, %s842_s25 }
   0xd   : > { %s39_s30 = ssub.s32 %s834_s23, %s1085_s27  ;;  %p52_p4 = por %p51_p2, %p50_p1 }
   0xe   : > { %s1089_s28 = smov (%p32_p3, %s1087_s28), 0  ;;  %s1091_s29 = smov (!%p32_p3, %s34_s29), %s842_s25 }
   0xf   : > { %1072 = sst [smem:[#allocation7_spill]] %s1089_s28  ;;  %s38_s6 = ssub.s32 %s838_s24, %s1089_s28 }
  0x10   : > { %s43_s7 = sadd.s32 1, %s818_s19  ;;  %p36_p5 = scmp.ge.s32.totalorder %s1091_s29, 4 }
  0x11   : > { %s40_s8 = sor.u32 %s39_s30, %s38_s6  ;;  %p656_p7 = scmp.ge.s32.totalorder %s846_s26, 24 }
  0x12   : > { %p41_p6 = scmp.eq.s32.totalorder %s40_s8, 0  ;;  %s1093_s29 = smov (%p36_p5, %s1091_s29), 0 }
  0x13   : > { %1073 = sst [smem:[#allocation8_spill]] %s1093_s29  ;;  %210 = sbr.rel (%p656_p7) target bundleno = 36 (0x24), region = 16 }
  0x14   : > { %s944_s9 = scalar_select %p41_p6, %s818_s19, %s43_s7  }
  0x18   : > { %213 = sbr.rel (!%p52_p4) target bundleno = 36 (0x24), region = 20  ;;  %s215_s10 = sand.u32 (%p52_p4), 1, %s818_s19  }
  0x19   : > { %s672_s11 = sshll.u32 (%p52_p4), %s838_s24, 2  ;;  %s657_s12 = sshll.u32 (%p52_p4), %s215_s10, 4 }
  0x1a   : > { %s220_s13 = sadd.s32 (%p52_p4), %s834_s23, %s672_s11  ;;  %s1074_s0 = sld [smem:[#allocation9_spill]] (%p52_p4) }
  0x1b   : > { %s660_s14 = sshll.u32 (%p52_p4), %s220_s13, 3  ;;  %s217_s30 = scalar_lea.vmem (%p52_p4), [#allocation3], %s657_s12 }
  0x20   : > { %s222_s17 = scalar_lea.vmem %s1074_s0, %s660_s14 }
  0x21   : > { %v253_v0 = vld [vmem:[%s222_s17] sm:$0xff]  ;;  %v255_v1 = vld [vmem:[%s222_s17 + $0x10] sm:$0xff] }
  0x22   : > { %254 = vst [vmem:[%s217_s30] sm:$0xff] %v253_v0 }
  0x23   : > { %256 = vst [vmem:[%s217_s30 + $0x8] sm:$0xff] %v255_v1 }
  0x24 PF: > { %p661_p8 = scmp.ge.s32.totalorder %s846_s26, 1  ;;  %p292_p9 = scmp.lt.s32.totalorder %s846_s26, 25 }
  0x26   : > { %p293_p10 = pnand %p661_p8, %p292_p9 }
  0x27   : > { %s299_s6 = sand.u32 (!%p293_p10), 1, %s814_s18   ;;  %s663_s7 = sshll.u32 (!%p293_p10), %s822_s20, 4 }
  0x28   : > { %296 = sbr.rel (%p293_p10) target bundleno = 511 (0x1ff), region = 74  ;;  %s957_s8 = sshll.u32 (!%p293_p10), %s299_s6, 4 }
  0x29   : > { %p350_p11 = scmp.lt.s32.totalorder (!%p293_p10), %s830_s22, 3  ;;  %p352_p12 = scmp.lt.s32.totalorder (!%p293_p10), %s663_s7, 31 }
  0x2a   : > { %s666_s25 = sshll.u32 (!%p293_p10), %s826_s21, 1  ;;  %p668_p0 = scmp.ne.s32.totalorder (!%p293_p10), %s822_s20, 0 }
  0x2b   : > { %p371_p13 = scmp.lt.s32.totalorder (!%p293_p10), %s666_s25, 5 }
  0x2d   : > { %s1095_s22 = smov (!%p350_p11, %s830_s22), 3  ;;  %s1097_s7 = smov (!%p352_p12, %s663_s7), 31 }
  0x2e   : > { %s664_s10 = sshll.u32 %s1095_s22, 5  ;;  %s361_s13 = scalar_lea.vmem %s1060_s2, %s1095_s22 }
  0x2f   : > { %s355_s18 = sadd.s32 %s664_s10, %s1097_s7  ;;  %s364_s16 = scalar_lea.vmem %s1061_s3, %s1095_s22 }
  0x30   : > { %s665_s17 = sshll.u32 %s355_s18, 3  ;;  %s367_s0 = scalar_lea.vmem %s1062_s4, %s1095_s22 }
  0x31   : > { %s979_s27 = scalar_lea.vmem %s1059_s1, %s665_s17  ;;  %s689_s24 = smul.u32 6, %s1095_s22 }
  0x32   : > { %s1099_s25 = smov (!%p371_p13, %s666_s25), 5  ;;  %s301_s18 = scalar_lea.vmem [#allocation3], %s957_s8 }
  0x33   : > { %s374_s11 = sadd.s32 %s689_s24, %s1099_s25  ;;  %381 = sbr.rel (%p668_p0) target bundleno = 59 (0x3b), region = 82 }
  0x34   : > { %s667_s7 = sshll.u32 %s374_s11, 3 }
  0x35   : > { %s986_s14 = scalar_lea.vmem %s1063_s5, %s667_s7 }
  0x38   : > { %v763_v2 = vld [vmem:[%s361_s13] ss:$0 sm:$0xff]  ;;  %vm386_vm0 = vcmask 457728  }
  0x39   : > { %387 = vst.msk [vmem:[#allocation2] sm:$0xff] %vm386_vm0, %v763_v2 }
  0x3a   : > { %388 = vst.msk [vmem:[#allocation2 + $0x8] sm:$0xff] %vm386_vm0, %v763_v2 }
  0x3b PF: > { %v408_v3 = vld [vmem:[%s979_s27 + $0x78] sm:$0xff]  ;;  %v407_v4 = vld [vmem:[%s979_s27 + $0x70] sm:$0xff]  ;;  %v406_v5 = vld [vmem:[%s979_s27 + $0x68] sm:$0xff]  ;;  %vm434_vm1 = vcmask 457728   ;;  %p669_p1 = scmp.ne.s32.totalorder %s822_s20, 1 }
  0x3c   : > { %409 = vmatpush.msra.mxu0 %v408_v3  ;;  %673 = vmatpush.msra.mxu1 %v408_v3  ;;  %v405_v6 = vld [vmem:[%s979_s27 + $0x60] sm:$0xff]  ;;  %v404_v7 = vld [vmem:[%s979_s27 + $0x58] sm:$0xff]  ;;  %v403_v8 = vld [vmem:[%s979_s27 + $0x50] sm:$0xff] }
  0x3d   : > { %v402_v9 = vld [vmem:[%s979_s27 + $0x48] sm:$0xff]  ;;  %v401_v10 = vld [vmem:[%s979_s27 + $0x40] sm:$0xff]  ;;  %v400_v11 = vld [vmem:[%s979_s27 + $0x38] sm:$0xff] }
  0x3e   : > { %410 = vmatpush.msra.mxu0 %v407_v4  ;;  %674 = vmatpush.msra.mxu1 %v407_v4  ;;  %v399_v12 = vld [vmem:[%s979_s27 + $0x30] sm:$0xff]  ;;  %v398_v13 = vld [vmem:[%s979_s27 + $0x28] sm:$0xff]  ;;  %v397_v14 = vld [vmem:[%s979_s27 + $0x20] sm:$0xff] }
  0x3f   : > { %v396_v15 = vld [vmem:[%s979_s27 + $0x18] sm:$0xff]  ;;  %v395_v16 = vld [vmem:[%s979_s27 + $0x10] sm:$0xff]  ;;  %v394_v17 = vld [vmem:[%s979_s27 + $0x8] sm:$0xff] }
  0x40   : > { %411 = vmatpush.msra.mxu0 %v406_v5  ;;  %675 = vmatpush.msra.mxu1 %v406_v5  ;;  %v393_v18 = vld [vmem:[%s979_s27] sm:$0xff]  ;;  %v392_v20 = vld [vmem:[%s301_s18 + $0x8] sm:$0xff] }
  0x41   : > { %v391_v19 = vld [vmem:[%s301_s18] sm:$0xff]  ;;  %v390_v22 = vld [vmem:[#allocation2 + $0x8] sm:$0xff] }
  0x42   : > { %412 = vmatpush.msra.mxu0 %v405_v6  ;;  %676 = vmatpush.msra.mxu1 %v405_v6  ;;  %v389_v21 = vld [vmem:[#allocation2] sm:$0xff] }
  0x44   : > { %413 = vmatpush.msra.mxu0 %v404_v7  ;;  %677 = vmatpush.msra.mxu1 %v404_v7 }
  0x46   : > { %414 = vmatpush.msra.mxu0 %v403_v8  ;;  %678 = vmatpush.msra.mxu1 %v403_v8 }
  0x48   : > { %415 = vmatpush.msra.mxu0 %v402_v9  ;;  %679 = vmatpush.msra.mxu1 %v402_v9 }
  0x4a   : > { %416 = vmatpush.msra.mxu0 %v401_v10  ;;  %680 = vmatpush.msra.mxu1 %v401_v10 }
  0x4c   : > { %417 = vmatpush.msra.mxu0 %v400_v11  ;;  %681 = vmatpush.msra.mxu1 %v400_v11 }
  0x4e   : > { %418 = vmatpush.msra.mxu0 %v399_v12  ;;  %682 = vmatpush.msra.mxu1 %v399_v12 }
  0x50   : > { %419 = vmatpush.msra.mxu0 %v398_v13  ;;  %683 = vmatpush.msra.mxu1 %v398_v13 }
  0x52   : > { %420 = vmatpush.msra.mxu0 %v397_v14  ;;  %684 = vmatpush.msra.mxu1 %v397_v14 }
  0x54   : > { %421 = vmatpush.msra.mxu0 %v396_v15  ;;  %685 = vmatpush.msra.mxu1 %v396_v15 }
  0x56   : > { %422 = vmatpush.msra.mxu0 %v395_v16  ;;  %686 = vmatpush.msra.mxu1 %v395_v16 }
  0x58   : > { %423 = vmatpush.msra.mxu0 %v394_v17  ;;  %687 = vmatpush.msra.mxu1 %v394_v17 }
  0x5a   : > { %424 = vmatpush.msra.mxu0 %v393_v18  ;;  %688 = vmatpush.msra.mxu1 %v393_v18 }
  0x5b   : > { %425 = vmatmul.f32.vlgmr.msra.gmra.mxu0 %v391_v19  ;;  %428 = vmatmul.f32.vlgmr.msra.gmra.mxu1 %v392_v20 }
  0xd8   : > { %v426_v23 = vpop.f32.mrf.mxu0  ;;  %v429_v24 = vpop.f32.mrf.mxu1  ;;  %440 = sbr.rel (%p669_p1) target bundleno = 511 (0x1ff), region = 86 }
  0xd9   : > { %v432_v25 = vadd.f32 %v426_v23, %v389_v21  ;;  %v433_v26 = vadd.f32 %v429_v24, %v390_v22 }
  0xdb   : > { %435 = vst.msk [vmem:[#allocation2] sm:$0xff] %vm434_vm1, %v432_v25 }
  0xdc   : > { %436 = vst.msk [vmem:[#allocation2 + $0x8] sm:$0xff] %vm434_vm1, %v433_v26 }
  0xdd   : > { %v848_v31 = vmov 56.0   ;;  %v764_v62 = vld [vmem:[%s364_s16] ss:$0 sm:$0xff] }
  0xde   : > { %766 = vrcp.f32 %v848_v31  ;;  %v765_v1 = vld [vmem:[%s367_s0] ss:$0 sm:$0xff] }
  0xe2   : > { %v441_v27 = vld [vmem:[#allocation2] sm:$0xff] }
  0xe3   : > { %v443_v28 = vsel %vm434_vm1, %v441_v27, 0.0  ;;  %v442_v29 = vld [vmem:[#allocation2 + $0x8] sm:$0xff] }
  0xe4   : > { %444 = vadd.xlane.f32.xlu0 %v443_v28  ;;  %v446_v30 = vsel %vm434_vm1, %v442_v29, 0.0  ;;  %v767_v32 = vpop.eup %766 }
  0xe5   : > { %v450_v33 = vmul.f32 56.0, %v767_v32  ;;  %vm454_vm2 = vweird.f32 %v767_v32 }
  0xe7   : > { %v451_v34 = vsub.f32 1.0, %v450_v33 }
  0xe9   : > { %v452_v35 = vmul.f32 %v767_v32, %v451_v34 }
  0xeb   : > { %v453_v36 = vadd.f32 %v767_v32, %v452_v35 }
  0xec   : > { %447 = vadd.xlane.f32.xlu0 %v446_v30 }
  0xed   : > { %v455_v37 = vsel %vm454_vm2, %v767_v32, %v453_v36 }
 0x157   : > { %v445_v38 = vpop.xlane.xlu0 %444 }
 0x158   : > { %v456_v39 = vmul.f32 %v455_v37, %v445_v38 }
 0x15a   : > { %v458_v40 = vsub.f32 %v441_v27, %v456_v39 }
 0x15c   : > { %v460_v41 = vmul.f32 %v458_v40, %v458_v40 }
 0x15e   : > { %v462_v42 = vsel %vm434_vm1, %v460_v41, 0.0 }
 0x15f   : > { %463 = vadd.xlane.f32.xlu1 %v462_v42  ;;  %v448_v43 = vpop.xlane.xlu0 %447 }
 0x160   : > { %v457_v44 = vmul.f32 %v455_v37, %v448_v43 }
 0x162   : > { %v459_v45 = vsub.f32 %v442_v29, %v457_v44 }
 0x164   : > { %v461_v46 = vmul.f32 %v459_v45, %v459_v45 }
 0x166   : > { %v465_v47 = vsel %vm434_vm1, %v461_v46, 0.0 }
 0x167   : > { %466 = vadd.xlane.f32.xlu1 %v465_v47 }
 0x1d2   : > { %v464_v48 = vpop.xlane.xlu1 %463 }
 0x1d3   : > { %v468_v49 = vmul.f32 %v464_v48, %v455_v37 }
 0x1d5   : > { %v470_v50 = vadd.f32 1e-05, %v468_v49 }
 0x1d7   : > { %768 = vrsqrt.f32 %v470_v50  ;;  %vm478_vm4 = vweird.f32 %v470_v50 }
 0x1da   : > { %v467_v51 = vpop.xlane.xlu1 %466 }
 0x1db   : > { %v469_v52 = vmul.f32 %v467_v51, %v455_v37 }
 0x1dd   : > { %v769_v53 = vpop.eup %768  ;;  %v471_v54 = vadd.f32 1e-05, %v469_v52 }
 0x1de   : > { %v473_v55 = vmul.f32 %v769_v53, %v470_v50  ;;  %vm479_vm3 = vweird.f32 %v769_v53 }
 0x1df   : > { %770 = vrsqrt.f32 %v471_v54  ;;  %vm480_vm5 = vmor %vm478_vm4, %vm479_vm3  ;;  %vm488_vm7 = vweird.f32 %v471_v54 }
 0x1e0   : > { %v474_v56 = vmul.f32 %v769_v53, %v473_v55 }
 0x1e2   : > { %v475_v57 = vmul.f32 0.5, %v474_v56 }
 0x1e4   : > { %v476_v58 = vsub.f32 1.5, %v475_v57 }
 0x1e5   : > { %v771_v59 = vpop.eup %770 }
 0x1e6   : > { %v477_v60 = vmul.f32 %v769_v53, %v476_v58  ;;  %v483_v61 = vmul.f32 %v771_v59, %v471_v54  ;;  %vm489_vm6 = vweird.f32 %v771_v59 }
 0x1e7   : > { %vm490_vm8 = vmor %vm488_vm7, %vm489_vm6 }
 0x1e8   : > { %v481_v63 = vsel %vm480_vm5, %v769_v53, %v477_v60  ;;  %v484_v0 = vmul.f32 %v771_v59, %v483_v61 }
 0x1e9   : > { %v492_v2 = vmul.f32 %v481_v63, %v458_v40 }
 0x1ea   : > { %v485_v3 = vmul.f32 0.5, %v484_v0 }
 0x1eb   : > { %v498_v4 = vmul.f32 %v764_v62, %v492_v2 }
 0x1ec   : > { %v486_v5 = vsub.f32 1.5, %v485_v3 }
 0x1ed   : > { %v504_v6 = vadd.f32 %v765_v1, %v498_v4 }
 0x1ee   : > { %v487_v7 = vmul.f32 %v771_v59, %v486_v5 }
 0x1ef   : > { %772 = vtanh.f32 %v504_v6 }
 0x1f0   : > { %v491_v8 = vsel %vm490_vm8, %v771_v59, %v487_v7 }
 0x1f1   : > { %v493_v9 = vmul.f32 %v491_v8, %v459_v45 }
 0x1f3   : > { %v499_v10 = vmul.f32 %v764_v62, %v493_v9 }
 0x1f5   : > { %v773_v11 = vpop.eup %772  ;;  %v505_v12 = vadd.f32 %v765_v1, %v499_v10 }
 0x1f6   : > { %508 = vst.msk [vmem:[%s986_s14] sm:$0xff] %vm434_vm1, %v773_v11 }
 0x1f7   : > { %774 = vtanh.f32 %v505_v12 }
 0x1fd   : > { %v775_v13 = vpop.eup %774 }
 0x1fe   : > { %509 = vst.msk [vmem:[%s986_s14 + $0x8] sm:$0xff] %vm434_vm1, %v775_v13 }
 0x1ff PF: > { %s15_s26 = sadd.s32 1, %s846_s26   ;;  %s1075_s21 = sld [smem:[#allocation4_spill]] }
 0x200   : > { %p12_p2 = scmp.ge.s32.totalorder %s15_s26, 26   ;;  %s1076_s22 = sld [smem:[#allocation5_spill]] }
 0x201   : > { %s1077_s0 = sld [smem:[#allocation6_spill]]  ;;  %s1080_s18 = smov %s818_s19 }
 0x202   : > { %s1078_s24 = sld [smem:[#allocation7_spill]]  ;;  %s1081_s19 = smov %s944_s9 }
 0x203   : > { %s1079_s25 = sld [smem:[#allocation8_spill]]  ;;  %s1082_s20 = smov %s834_s23 }
 0x204   :  { %14 = sbr.rel (!%p12_p2) target bundleno = 7 (0x7), region = 133 }
 0x207   : > { %s1083_s23 = smov %s1077_s0 }

// kernel: critic_ensemble_forward.3
= control target key start
LH: loop header
LB: loop body
LE: loop exit
PB: predicated region body
PF: predicated region fallthrough
CT: control target
= control target key end

     0   :  { %s1256_s30 = smov 0   ;;  %s1258_s10 = smov 0   ;;  %s1421_s0 = inlined_call_operand.vmem [shape: f32[4,48,56], index: 0, kind: input, shape index: {}]   ;;  %s1422_s1 = inlined_call_operand.vmem [shape: f32[48,8], index: 1, kind: input, shape index: {}]   ;;  %s1423_s2 = inlined_call_operand.vmem [shape: f32[2,4,56,64], index: 2, kind: input, shape index: {}]   ;;  %s1424_s3 = inlined_call_operand.vmem [shape: f32[2,4,8,64], index: 3, kind: input, shape index: {}]   ;;  %s1425_s4 = inlined_call_operand.vmem [shape: f32[2,4,1,64], index: 4, kind: input, shape index: {}]   ;;  %s1426_s5 = inlined_call_operand.vmem [shape: f32[2,4,64,64], index: 5, kind: input, shape index: {}]   ;;  %s1427_s6 = inlined_call_operand.vmem [shape: f32[2,4,1,64], index: 6, kind: input, shape index: {}]   ;;  %s1428_s7 = inlined_call_operand.vmem [shape: f32[2,4,64,1], index: 7, kind: input, shape index: {}]   ;;  %s1429_s8 = inlined_call_operand.vmem [shape: f32[2,4,1,1], index: 8, kind: input, shape index: {}]   ;;  %s1430_s9 = inlined_call_operand.vmem [shape: f32[2,4,48,1], index: 9, kind: output, shape index: {}]  }
   0x1   :  { %s1260_s11 = smov 0   ;;  %s1262_s12 = smov 0  }
   0x2   :  { %s1264_s13 = smov 0   ;;  %s1266_s14 = smov 0  }
   0x3   :  { %s1268_s15 = smov 0  }
   0x4 LB: > { %1432 = sst [smem:[#allocation2_spill]] %s1200_s14  ;;  %s31_s16 = sadd.s32 1, %s1192_s12  ;;  %s1204_s15 = sphi %s1268_s15, %s19_s15   ;;  %s1200_s14 = sphi %s1266_s14, %s1440_s14   ;;  %s1196_s13 = sphi %s1264_s13, %s1444_s13   ;;  %s1192_s12 = sphi %s1262_s12, %s1443_s12   ;;  %s1188_s11 = sphi %s1260_s11, %s1437_s11   ;;  %s1184_s10 = sphi %s1258_s10, %s1442_s10   ;;  %s1180_s30 = sphi %s1256_s30, %s1441_s30  }
   0x5   : > { %p32_p0 = scmp.ge.s32.totalorder %s31_s16, 3  ;;  %s34_s17 = sadd.s32 1, %s1196_s13 }
   0x6   : > { %p1050_p1 = scmp.ge.s32.totalorder %s1204_s15, 1  ;;  %p433_p2 = scmp.lt.s32.totalorder %s1204_s15, 25 }
   0x7   : > { %s1446_s16 = smov (%p32_p0, %s31_s16), 0  ;;  %s1448_s17 = smov (!%p32_p0, %s34_s17), %s1196_s13 }
   0x8   : > { %1433 = sst [smem:[#allocation3_spill]] %s1446_s16  ;;  %p434_p3 = pnand %p1050_p1, %p433_p2 }
   0x9   : > { %p36_p4 = scmp.ge.s32.totalorder %s1448_s17, 4  ;;  %s38_s18 = sadd.s32 1, %s1200_s14 }
   0xa   : > { %p543_p6 = scmp.lt.s32.totalorder (!%p434_p3), %s1184_s10, 3  ;;  %p558_p7 = scmp.lt.s32.totalorder (!%p434_p3), %s1188_s11, 1 }
   0xb   : > { %s1450_s17 = smov (%p36_p4, %s1448_s17), 0  ;;  %s1452_s18 = smov (!%p36_p4, %s38_s18), %s1200_s14 }
   0xc   : > { %1434 = sst [smem:[#allocation4_spill]] %s1450_s17  ;;  %p40_p5 = scmp.ge.s32.totalorder %s1452_s18, 2 }
   0xd   : > { %437 = sbr.rel (%p434_p3) target bundleno = 450 (0x1c2), region = 56  ;;  %s1051_s19 = sshll.u32 (!%p434_p3), %s1180_s30, 1 }
   0xe   : > { %s1454_s18 = smov (%p40_p5, %s1452_s18), 0  ;;  %p1306_p8 = scmp.lt.s32.totalorder (!%p434_p3), %s1051_s19, 5 }
   0xf   : > { %1435 = sst [smem:[#allocation5_spill]] %s1454_s18 }
  0x12   : > { %s1456_s10 = smov (!%p543_p6, %s1184_s10), 3  ;;  %s1458_s11 = smov (!%p558_p7, %s1188_s11), 1  ;;  %vm640_vm0 = vcmask 64512   ;;  %vm670_vm1 = vcmask 457728   ;;  %vm720_vm2 = vcmask 523264   ;;  %vm793_vm3 = vcmask 7168  }
  0x13   : > { %s1088_s20 = smul.u32 7, %s1456_s10  ;;  %s1056_s23 = sshll.u32 %s1458_s11, 2 }
  0x14   : > { %s1089_s22 = smul.u32 28, %s1458_s11  ;;  %s1313_s24 = sadd.s32 %s1056_s23, %s1456_s10 }
  0x15   : > { %s1087_s25 = smul.u32 6, %s1456_s10  ;;  %s1057_s27 = sshll.u32 %s1313_s24, 3 }
  0x16   : > { %s564_s26 = sadd.s32 %s1089_s22, %s1088_s20  ;;  %s574_s18 = scalar_lea.vmem %s1424_s3, %s1057_s27 }
  0x17   : > { %s1055_s28 = sshll.u32 %s564_s26, 3  ;;  %v639_v0 = vld [vmem:[%s574_s18] sm:$0xff]  ;;  %s1090_s23 = smul.u32 24, %s1458_s11 }
  0x18   : > { %s1323_s14 = scalar_lea.vmem %s1423_s2, %s1055_s28  ;;  %662 = vmatpush.msra.mxu0 %v639_v0  ;;  %s1460_s19 = smov (!%p1306_p8, %s1051_s19), 5 }
  0x19   : > { %v638_v1 = vld [vmem:[%s1323_s14 + $0x30] sm:$0xff]  ;;  %v637_v2 = vld [vmem:[%s1323_s14 + $0x28] sm:$0xff]  ;;  %s1059_s20 = sshll.u32 %s1456_s10, 3  ;;  %s1060_s22 = sshll.u32 %s1458_s11, 5  ;;  %v636_v3 = vld [vmem:[%s1323_s14 + $0x20] sm:$0xff] }
  0x1a   : > { %686 = vmatpush.msra.mxu1 %v638_v1  ;;  %s1054_s26 = sshll.u32 %s1460_s19, 3  ;;  %s548_s16 = sadd.s32 %s1087_s25, %s1460_s19  ;;  %v635_v4 = vld [vmem:[%s1323_s14 + $0x18] sm:$0xff]  ;;  %v634_v6 = vld [vmem:[%s1323_s14 + $0x10] sm:$0xff]  ;;  %v633_v7 = vld [vmem:[%s1323_s14 + $0x8] sm:$0xff] }
  0x1b   : > { %s556_s18 = scalar_lea.vmem %s1422_s1, %s1054_s26  ;;  %s1337_s28 = sadd.s32 %s1090_s23, %s548_s16  ;;  %v632_v10 = vld [vmem:[%s1323_s14] sm:$0xff] }
  0x1c   : > { %687 = vmatpush.msra.mxu1 %v637_v2  ;;  %v630_v5 = vld [vmem:[%s556_s18] sm:$0xff]  ;;  %s1052_s10 = sshll.u32 %s548_s16, 3  ;;  %s1340_s11 = sadd.s32 %s1060_s22, %s1059_s20  ;;  %v631_v11 = vld [vmem:[%s556_s18 + $0x8] sm:$0xff] }
  0x1d   : > { %1069 = vmatmul.msk.f32.vlgmr.msra.gmra.mxu0 %vm640_vm0, %v630_v5  ;;  %s1061_s19 = sshll.u32 %s1340_s11, 3  ;;  %s550_s20 = scalar_lea.vmem %s1421_s0, %s1052_s10 }
  0x1e   : > { %688 = vmatpush.msra.mxu1 %v636_v3  ;;  %s1349_s29 = scalar_lea.vmem %s1426_s5, %s1061_s19  ;;  %s581_s16 = scalar_lea.vmem %s1425_s4, %s1313_s24  ;;  %v628_v12 = vld [vmem:[%s550_s20] sm:$0xff]  ;;  %v629_v15 = vld [vmem:[%s550_s20 + $0x8] sm:$0xff] }
  0x1f   : > { %v715_v8 = vld [vmem:[%s1349_s29 + $0x38] sm:$0xff]  ;;  %v714_v9 = vld [vmem:[%s1349_s29 + $0x30] sm:$0xff]  ;;  %v713_v13 = vld [vmem:[%s1349_s29 + $0x28] sm:$0xff]  ;;  %s597_s27 = scalar_lea.vmem %s1427_s6, %s1313_s24  ;;  %s606_s21 = scalar_lea.vmem %s1428_s7, %s1061_s19 }
  0x20   : > { %689 = vmatpush.msra.mxu1 %v635_v4  ;;  %735 = vmatpush.msrb.mxu0 %v715_v8  ;;  %v712_v14 = vld [vmem:[%s1349_s29 + $0x20] sm:$0xff]  ;;  %v711_v16 = vld [vmem:[%s1349_s29 + $0x18] sm:$0xff]  ;;  %v710_v17 = vld [vmem:[%s1349_s29 + $0x10] sm:$0xff]  ;;  %s613_s30 = scalar_lea.vmem %s1429_s8, %s1313_s24  ;;  %s1068_s22 = sshll.u32 %s1337_s28, 3 }
  0x21   : > { %1079 = vmatpush.msra.mxu2 %v715_v8  ;;  %v709_v18 = vld [vmem:[%s1349_s29 + $0x8] sm:$0xff]  ;;  %v708_v19 = vld [vmem:[%s1349_s29] sm:$0xff]  ;;  %v759_v20 = vld [vmem:[%s606_s21 + $0x38] sm:$0xff]  ;;  %s626_s14 = scalar_lea.vmem %s1430_s9, %s1068_s22 }
  0x22   : > { %690 = vmatpush.msra.mxu1 %v634_v6  ;;  %736 = vmatpush.msrb.mxu0 %v714_v9  ;;  %v758_v21 = vld [vmem:[%s606_s21 + $0x30] sm:$0xff]  ;;  %v757_v22 = vld [vmem:[%s606_s21 + $0x28] sm:$0xff]  ;;  %v756_v23 = vld [vmem:[%s606_s21 + $0x20] sm:$0xff] }
  0x23   : > { %1080 = vmatpush.msra.mxu2 %v714_v9  ;;  %778 = vmatpush.msra.mxu3 %v759_v20  ;;  %v755_v24 = vld [vmem:[%s606_s21 + $0x18] sm:$0xff]  ;;  %v1147_v26 = vld [vmem:[%s581_s16] ss:$0 sm:$0xff]  ;;  %v754_v36 = vld [vmem:[%s606_s21 + $0x10] sm:$0xff] }
  0x24   : > { %691 = vmatpush.msra.mxu1 %v633_v7  ;;  %737 = vmatpush.msrb.mxu0 %v713_v13  ;;  %v753_v37 = vld [vmem:[%s606_s21 + $0x8] sm:$0xff]  ;;  %v752_v38 = vld [vmem:[%s606_s21] sm:$0xff] }
  0x25   : > { %1070 = vmatmul.msk.f32.gmra.mxu0 %vm640_vm0, %v631_v11  ;;  %1081 = vmatpush.msra.mxu2 %v713_v13  ;;  %v1148_v39 = vld [vmem:[%s597_s27] ss:$0 sm:$0xff] }
  0x26   : > { %692 = vmatpush.msra.mxu1 %v632_v10  ;;  %738 = vmatpush.msrb.mxu0 %v712_v14  ;;  %v1149_v46 = vld [vmem:[%s613_s30] ss:$0 sm:$0xff] }
  0x27   : > { %1071 = vmatmul.msk.f32.vlgmr.msra.gmra.mxu1 %vm670_vm1, %v628_v12  ;;  %1082 = vmatpush.msra.mxu2 %v712_v14 }
  0x28   : > { %739 = vmatpush.msrb.mxu0 %v711_v16  ;;  %779 = vmatpush.msra.mxu3 %v758_v21 }
  0x29   : > { %1083 = vmatpush.msra.mxu2 %v711_v16 }
  0x2a   : > { %740 = vmatpush.msrb.mxu0 %v710_v17  ;;  %780 = vmatpush.msra.mxu3 %v757_v22 }
  0x2b   : > { %1084 = vmatpush.msra.mxu2 %v710_v17 }
  0x2c   : > { %741 = vmatpush.msrb.mxu0 %v709_v18  ;;  %781 = vmatpush.msra.mxu3 %v756_v23 }
  0x2d   : > { %1085 = vmatpush.msra.mxu2 %v709_v18 }
  0x2e   : > { %742 = vmatpush.msrb.mxu0 %v708_v19  ;;  %782 = vmatpush.msra.mxu3 %v755_v24 }
  0x2f   : > { %1072 = vmatmul.msk.f32.gmra.mxu1 %vm670_vm1, %v629_v15  ;;  %1086 = vmatpush.msra.mxu2 %v708_v19 }
  0x30   : > { %783 = vmatpush.msra.mxu3 %v754_v36 }
  0x32   : > { %784 = vmatpush.msra.mxu3 %v753_v37 }
  0x34   : > { %785 = vmatpush.msra.mxu3 %v752_v38 }
  0x9a   : > { %v664_v25 = vpop.f32.mrf.mxu0 }
  0xa2   : > { %v667_v31 = vpop.f32.mrf.mxu0 }
  0xa4   : > { %v694_v27 = vpop.f32.mrf.mxu1 }
  0xa5   : > { %v695_v28 = vadd.f32 %v694_v27, %v664_v25 }
  0xa7   : > { %v704_v29 = vadd.f32 %v1147_v26, %v695_v28 }
  0xa9   : > { %v706_v30 = vmax.f32 %v704_v29, 0.0 }
  0xab   : > { %1073 = vmatmul.msk.f32.vlgmr.msrb.gmra.mxu0 %vm720_vm2, %v706_v30 }
  0xac   : > { %v697_v32 = vpop.f32.mrf.mxu1 }
  0xad   : > { %v698_v33 = vadd.f32 %v697_v32, %v667_v31 }
  0xaf   : > { %v705_v34 = vadd.f32 %v1147_v26, %v698_v33 }
  0xb1   : > { %v707_v35 = vmax.f32 %v705_v34, 0.0 }
  0xb3   : > { %1074 = vmatmul.msk.f32.vlgmr.msra.gmra.mxu2 %vm720_vm2, %v707_v35 }
 0x128   : > { %v744_v40 = vpop.f32.mrf.mxu0 }
 0x129   : > { %v745_v41 = vadd.f32 %v1148_v39, %v744_v40 }
 0x12b   : > { %v750_v42 = vmax.f32 %v745_v41, 0.0 }
 0x12d   : > { %1075 = vmatmul.msk.f32.vlgmr.msra.gmra.mxu3 %vm720_vm2, %v750_v42 }
 0x136   : > { %v747_v43 = vpop.f32.mrf.mxu2 }
 0x137   : > { %v748_v44 = vadd.f32 %v1148_v39, %v747_v43 }
 0x139   : > { %v751_v45 = vmax.f32 %v748_v44, 0.0 }
 0x13b   : > { %1076 = vmatmul.msk.f32.gmra.mxu3 %vm720_vm2, %v751_v45 }
 0x1b0   : > { %v787_v47 = vpop.f32.mrf.mxu3 }
 0x1b1   : > { %v788_v48 = vadd.f32 %v1149_v46, %v787_v47 }
 0x1b3   : > { %794 = vst.msk [vmem:[%s626_s14] sm:$0xff] %vm793_vm3, %v788_v48 }
 0x1be   : > { %v790_v49 = vpop.f32.mrf.mxu3 }
 0x1bf   : > { %v791_v50 = vadd.f32 %v1149_v46, %v790_v49 }
 0x1c1   : > { %795 = vst.msk [vmem:[%s626_s14 + $0x8] sm:$0xff] %vm793_vm3, %v791_v50 }
 0x1c2 PF: > { %s19_s15 = sadd.s32 1, %s1204_s15   ;;  %s1437_s11 = sld [smem:[#allocation2_spill]] }
 0x1c3   : > { %p16_p9 = scmp.ge.s32.totalorder %s19_s15, 26   ;;  %s1438_s24 = sld [smem:[#allocation3_spill]] }
 0x1c4   : > { %s1439_s28 = sld [smem:[#allocation4_spill]]  ;;  %s1441_s30 = smov %s1192_s12 }
 0x1c5   : > { %s1440_s14 = sld [smem:[#allocation5_spill]]  ;;  %s1442_s10 = smov %s1196_s13 }
 0x1c6   :  { %18 = sbr.rel (!%p16_p9) target bundleno = 4 (0x4), region = 110 }
 0x1c9   : > { %s1443_s12 = smov %s1438_s24 }
 0x1ca   : > { %s1444_s13 = smov %s1439_s28 }

</bundles_post_ra>
